<compile_context>
chip_gen: v6e
topology: v6e:2x2x1
jax: 0.10.0
libtpu: 0.0.40
codegen_flags: <defaults>
</compile_context>

<pallas_src>
from collections import deque

import jax
import jax.numpy as jnp
from jax.experimental import pallas as pl
from jax.experimental.pallas import tpu as pltpu

LANE = 128


# ---------------------------------------------------------------------------
# Fused Pallas kernel: K-tiled linear head + ReLU on the same x chunk
# ---------------------------------------------------------------------------
def _fused_linear_relu_kernel(x_ref, w_ref, b_ref, lin_ref, relu_ref, acc_ref):
    # x_ref:   [N, tk]    current K-chunk of the flattened input
    # w_ref:   [tk, HP]   matching K-chunk of the (128-padded) weight
    # b_ref:   [1, HP]    bias (resident across the K axis)
    # lin_ref: [N, HP]    linear output (written on the last K step)
    # relu_ref:[N, tk]    ReLU of this K-chunk of x (lane-dense store)
    # acc_ref: [N, HP]    f32 accumulator scratch
    k = pl.program_id(0)

    @pl.when(k == 0)
    def _init():
        acc_ref[...] = jnp.zeros_like(acc_ref)

    acc_ref[...] += jnp.dot(
        x_ref[...], w_ref[...], preferred_element_type=jnp.float32
    )

    # Elementwise ReLU shares the x DMA; output chunk is a full-lane store.
    relu_ref[...] = jnp.maximum(x_ref[...], 0.0).astype(relu_ref.dtype)

    @pl.when(k == pl.num_programs(0) - 1)
    def _finish():
        lin_ref[...] = (acc_ref[...] + b_ref[...]).astype(lin_ref.dtype)


def fused_linear_relu(x_flat, w_pad, b_pad, *, tk=512):
    """x_flat: [N, F]; w_pad: [F, HP]; b_pad: [1, HP] (HP multiple of 128).

    Returns (linear_out [N, HP], relu_out [N, F]) from one pallas_call.
    Tile sizes are small enough for v7x's 32 MiB scoped-VMEM default.
    """
    n, f = x_flat.shape
    hp = w_pad.shape[1]
    tk = min(tk, f)
    assert f % tk == 0, "feature dim must be divisible by the K tile"
    assert hp % LANE == 0, "padded hidden dim must be a multiple of 128"

    return pl.pallas_call(
        _fused_linear_relu_kernel,
        out_shape=(
            jax.ShapeDtypeStruct((n, hp), x_flat.dtype),  # linear (padded)
            jax.ShapeDtypeStruct((n, f), x_flat.dtype),   # relu (flat slab)
        ),
        grid_spec=pltpu.PrefetchScalarGridSpec(
            num_scalar_prefetch=0,
            grid=(f // tk,),
            in_specs=[
                pl.BlockSpec((n, tk), lambda k: (0, k)),   # x K-chunk
                pl.BlockSpec((tk, hp), lambda k: (k, 0)),  # w K-chunk
                pl.BlockSpec((1, hp), lambda k: (0, 0)),   # bias (resident)
            ],
            out_specs=(
                pl.BlockSpec((n, hp), lambda k: (0, 0)),   # linear (revisited)
                pl.BlockSpec((n, tk), lambda k: (0, k)),   # relu chunk
            ),
            scratch_shapes=[pltpu.VMEM((n, hp), jnp.float32)],
        ),
        compiler_params=pltpu.CompilerParams(
            # K is a reduction axis (linear output block is revisited).
            dimension_semantics=("arbitrary",),
        ),
    )(x_flat, w_pad, b_pad)


# ---------------------------------------------------------------------------
# Synthetic inner model (nested outputs) + Flatten wrapper
# ---------------------------------------------------------------------------
class InnerModel:
    """Returns a nested structure of arrays, like a torch model might."""

    def __init__(self, in_features, hidden, dtype=jnp.float32):
        key = jax.random.PRNGKey(0)
        kw, kb = jax.random.split(key)
        self.hidden = hidden
        self.w = jax.random.normal(kw, (in_features, hidden), dtype) * 0.02
        self.b = jax.random.normal(kb, (1, hidden), dtype) * 0.02
        # Pad the head to a lane-dense (multiple-of-128) output width; padded
        # columns stay zero so slicing afterwards reproduces the exact result.
        hp = ((hidden + LANE - 1) // LANE) * LANE
        self.w_pad = jnp.zeros((in_features, hp), dtype).at[:, :hidden].set(self.w)
        self.b_pad = jnp.zeros((1, hp), dtype).at[:, :hidden].set(self.b)

    def __call__(self, x):
        n = x.shape[0]
        x_flat = x.reshape(n, -1)  # row-major, same as torch .view(N, -1)
        lin_pad, relu_flat = fused_linear_relu(x_flat, self.w_pad, self.b_pad)
        linear_out = lin_pad[:, : self.hidden]   # drop zero-padded columns
        relu_out = relu_flat.reshape(x.shape)    # back to NCHW (free plumbing)
        # Nested output structure (dict of tuple / tensor).
        return {"feat": (linear_out,), "act": relu_out}


def flatten(inputs):
    """Exact port of the reference BFS flatten (torch.Tensor -> jnp array)."""
    queue = deque([inputs])
    outputs = []
    while queue:
        x = queue.popleft()
        if isinstance(x, (list, tuple)):
            queue.extend(x)
        elif isinstance(x, dict):
            queue.extend(x.values())
        elif isinstance(x, jnp.ndarray):
            outputs.append(x)
    return outputs


class Flatten:
    def __init__(self, model):
        self.model = model

    def forward(self, *args, **kwargs):
        outputs = self.model(*args, **kwargs)
        return flatten(outputs)

    __call__ = forward


# ---------------------------------------------------------------------------
if __name__ == "__main__":
    N, C, H, W = 2, 4, 16, 16
    HIDDEN = 32

    key = jax.random.PRNGKey(0)
    x = jax.random.normal(key, (N, C, H, W), jnp.float32)  # layout: NCHW

    model = Flatten(InnerModel(C * H * W, HIDDEN))
    outs = model(x)

    for o in outs:
        jax.block_until_ready(o)

    # Sanity checks against a plain-JAX reference.
    # BFS flatten of {"feat": (linear,), "act": relu}:
    #   depth 1 yields the bare array `relu` first; `linear` (inside the
    #   tuple) is emitted at depth 2 -> outs == [relu, linear].
    ref_linear = x.reshape(N, -1) @ model.model.w + model.model.b
    ref_relu = jnp.maximum(x, 0.0)
    assert len(outs) == 2
    assert outs[0].shape == (N, C, H, W)
    assert outs[1].shape == (N, HIDDEN)
    assert jnp.allclose(outs[0], ref_relu)
    assert jnp.allclose(outs[1], ref_linear, atol=1e-4, rtol=1e-4)

    print("KERNEL_OK")
</pallas_src>

<mosaic_0001>
module attributes {stable_mosaic.version = 11 : i64} {
  func.func @_fused_linear_relu_kernel(%arg0: i32, %arg1: memref<2x512xf32, #tpu.memory_space<vmem>>, %arg2: memref<512x128xf32, #tpu.memory_space<vmem>>, %arg3: memref<1x128xf32, #tpu.memory_space<vmem>>, %arg4: memref<2x128xf32, #tpu.memory_space<vmem>>, %arg5: memref<2x512xf32, #tpu.memory_space<vmem>>, %arg6: memref<2x128xf32, #tpu.memory_space<vmem>>) attributes {dimension_semantics = [#tpu.dimension_semantics<arbitrary>], iteration_bounds = array<i64: 2>, scalar_prefetch = 0 : i64, scratch_operands = 1 : i64, tpu.core_type = #tpu.core_type<tc>, window_params = [{transform_indices = @transform_0, window_bounds = array<i64: 2, 512>}, {transform_indices = @transform_1, window_bounds = array<i64: 512, 128>}, {pipeline_mode = #tpu.pipeline_mode<synchronous>, transform_indices = @transform_2, window_bounds = array<i64: 1, 128>}, {pipeline_mode = #tpu.pipeline_mode<synchronous>, transform_indices = @transform_3, window_bounds = array<i64: 2, 128>}, {transform_indices = @transform_4, window_bounds = array<i64: 2, 512>}]} {
    %c0_i32 = arith.constant 0 : i32
    %0 = arith.cmpi eq, %arg0, %c0_i32 : i32
    %1 = arith.extui %0 : i1 to i32
    %c0_i32_0 = arith.constant 0 : i32
    %2 = arith.cmpi ne, %1, %c0_i32_0 : i32
    scf.if %2 {
      %cst_14 = arith.constant 0.000000e+00 : f32
      %16 = vector.broadcast %cst_14 : f32 to vector<2x128xf32>
      %c0_15 = arith.constant 0 : index
      %c0_16 = arith.constant 0 : index
      %17 = vector.load %arg6[%c0_15, %c0_16] : memref<2x128xf32, #tpu.memory_space<vmem>>, vector<2x128xf32>
      tpu.vector_store %arg6[%c0_15, %c0_16], %16 {strides = array<i32>} : memref<2x128xf32, #tpu.memory_space<vmem>>, vector<2x128xf32>,
    } else {
    }
    %c0 = arith.constant 0 : index
    %c0_1 = arith.constant 0 : index
    %3 = vector.load %arg6[%c0, %c0_1] : memref<2x128xf32, #tpu.memory_space<vmem>>, vector<2x128xf32>
    %c0_2 = arith.constant 0 : index
    %c0_3 = arith.constant 0 : index
    %4 = vector.load %arg1[%c0_2, %c0_3] : memref<2x512xf32, #tpu.memory_space<vmem>>, vector<2x512xf32>
    %c0_4 = arith.constant 0 : index
    %c0_5 = arith.constant 0 : index
    %5 = vector.load %arg2[%c0_4, %c0_5] : memref<512x128xf32, #tpu.memory_space<vmem>>, vector<512x128xf32>
    %cst = arith.constant dense<0.000000e+00> : vector<2x128xf32>
    %6 = tpu.matmul %4, %5, %cst {dimension_numbers = #tpu.dot_dimension_numbers<[1], [0], [0], [1], [0, 0, 1, 1], [], []>} : vector<2x512xf32>, vector<512x128xf32>, vector<2x128xf32> -> vector<2x128xf32>
    %7 = arith.addf %3, %6 : vector<2x128xf32>
    %c0_6 = arith.constant 0 : index
    %c0_7 = arith.constant 0 : index
    %8 = vector.load %arg6[%c0_6, %c0_7] : memref<2x128xf32, #tpu.memory_space<vmem>>, vector<2x128xf32>
    tpu.vector_store %arg6[%c0_6, %c0_7], %7 {strides = array<i32>} : memref<2x128xf32, #tpu.memory_space<vmem>>, vector<2x128xf32>,
    %c0_8 = arith.constant 0 : index
    %c0_9 = arith.constant 0 : index
    %9 = vector.load %arg1[%c0_8, %c0_9] : memref<2x512xf32, #tpu.memory_space<vmem>>, vector<2x512xf32>
    %cst_10 = arith.constant 0.000000e+00 : f32
    %10 = vector.broadcast %cst_10 : f32 to vector<2x512xf32>
    %11 = arith.maximumf %9, %10 : vector<2x512xf32>
    %c0_11 = arith.constant 0 : index
    %c0_12 = arith.constant 0 : index
    %12 = vector.load %arg5[%c0_11, %c0_12] : memref<2x512xf32, #tpu.memory_space<vmem>>, vector<2x512xf32>
    tpu.vector_store %arg5[%c0_11, %c0_12], %11 {strides = array<i32>} : memref<2x512xf32, #tpu.memory_space<vmem>>, vector<2x512xf32>,
    %c1_i32 = arith.constant 1 : i32
    %13 = arith.cmpi eq, %arg0, %c1_i32 : i32
    %14 = arith.extui %13 : i1 to i32
    %c0_i32_13 = arith.constant 0 : i32
    %15 = arith.cmpi ne, %14, %c0_i32_13 : i32
    scf.if %15 {
      %c0_14 = arith.constant 0 : index
      %c0_15 = arith.constant 0 : index
      %16 = vector.load %arg6[%c0_14, %c0_15] : memref<2x128xf32, #tpu.memory_space<vmem>>, vector<2x128xf32>
      %c0_16 = arith.constant 0 : index
      %c0_17 = arith.constant 0 : index
      %17 = vector.load %arg3[%c0_16, %c0_17] : memref<1x128xf32, #tpu.memory_space<vmem>>, vector<1x128xf32>
      %18 = vector.broadcast %17 : vector<1x128xf32> to vector<2x128xf32>
      %19 = arith.addf %16, %18 : vector<2x128xf32>
      %c0_18 = arith.constant 0 : index
      %c0_19 = arith.constant 0 : index
      %20 = vector.load %arg4[%c0_18, %c0_19] : memref<2x128xf32, #tpu.memory_space<vmem>>, vector<2x128xf32>
      tpu.vector_store %arg4[%c0_18, %c0_19], %19 {strides = array<i32>} : memref<2x128xf32, #tpu.memory_space<vmem>>, vector<2x128xf32>,
    } else {
    }
    return
  }
  func.func @transform_0(%arg0: i32) -> (i32, i32) {
    %c0_i32 = arith.constant 0 : i32
    %c0_i32_0 = arith.constant 0 : i32
    return %c0_i32, %arg0 : i32, i32
  }
  func.func @transform_1(%arg0: i32) -> (i32, i32) {
    %c0_i32 = arith.constant 0 : i32
    %c0_i32_0 = arith.constant 0 : i32
    return %arg0, %c0_i32 : i32, i32
  }
  func.func @transform_2(%arg0: i32) -> (i32, i32) {
    %c0_i32 = arith.constant 0 : i32
    %c0_i32_0 = arith.constant 0 : i32
    %c0_i32_1 = arith.constant 0 : i32
    return %c0_i32, %c0_i32_0 : i32, i32
  }
  func.func @transform_3(%arg0: i32) -> (i32, i32) {
    %c0_i32 = arith.constant 0 : i32
    %c0_i32_0 = arith.constant 0 : i32
    %c0_i32_1 = arith.constant 0 : i32
    return %c0_i32, %c0_i32_0 : i32, i32
  }
  func.func @transform_4(%arg0: i32) -> (i32, i32) {
    %c0_i32 = arith.constant 0 : i32
    %c0_i32_0 = arith.constant 0 : i32
    return %c0_i32, %arg0 : i32, i32
  }
}

</mosaic_0001>

<bundles_post_ra>
// kernel: tpu_custom_call.1
= control target key start
LH: loop header
LB: loop body
LE: loop exit
PB: predicated region body
PF: predicated region fallthrough
CT: control target
= control target key end

     0   :  { %10 = vsyncpa [#allocation4], 0  ;;  %s1280_s0 = inlined_call_operand.hbm [shape: f32[2,1024], index: 0, kind: input, shape index: {}]   ;;  %s1281_s1 = inlined_call_operand.hbm [shape: f32[1024,128], index: 1, kind: input, shape index: {}]   ;;  %s1282_s2 = inlined_call_operand.vmem [shape: f32[1,128], index: 2, kind: input, shape index: {}]   ;;  %s1283_s3 = inlined_call_operand.hbm [shape: f32[2,128], index: 3, kind: output, shape index: {0}]   ;;  %s1284_s4 = inlined_call_operand.hbm [shape: f32[2,1024], index: 4, kind: output, shape index: {1}]  }
   0x1   :  { %12 = vsyncpa [#allocation4 + $0x1], 0 }
   0x2   :  { %13 = vsyncpa [#allocation7], 0 }
   0x3   :  { %15 = vsyncpa [#allocation7 + $0x1], 0 }
   0x4   :  { %16 = vsyncpa [#allocation5], 0 }
   0x5   :  { %17 = vsyncpa [#allocation10], 0 }
   0x6   :  { %19 = vsyncpa [#allocation10 + $0x1], 0  ;;  %s986_s15 = smov 0   ;;  %s988_s16 = smov 0  }
   0x7   :  { %s990_s17 = smov 0   ;;  %s992_s18 = smov 0  }
   0x8 LB: > { %s1007_s19 = sadd.s32 4294967295, %s951_s18   ;;  %s640_s20 = sadd.s32 4294967294, %s951_s18   ;;  %s951_s18 = sphi %s992_s18, %s1307_s18   ;;  %s947_s17 = sphi %s990_s17, %s1306_s17   ;;  %s943_s16 = sphi %s988_s16, %s1305_s16   ;;  %s939_s15 = sphi %s986_s15, %s1304_s15  }
   0x9   : > { %s1011_s21 = sadd.s32 1, %s951_s18   ;;  %s32_s22 = sadd.s32 1, %s947_s17 }
   0xa   : > { %s29_s23 = ssub.s32 %s951_s18, %s1011_s21  ;;  %p39_p0 = scmp.ne.s32.totalorder %s947_s17, %s943_s16 }
   0xb   : > { %p30_p1 = scmp.eq.s32.totalorder %s29_s23, 0  ;;  %p40_p2 = scmp.eq.s32.totalorder %s951_s18, 0 }
   0xc   : > { %p45_p3 = scmp.ne.s32.totalorder %s943_s16, %s939_s15  ;;  %p46_p4 = scmp.eq.s32.totalorder %s1007_s19, 0 }
   0xd   : > { %s1023_s24 = scalar_select %p30_p1, %s947_s17, %s32_s22  }
   0xe   : > { %p1025_p5 = por %p40_p2, %p39_p0  ;;  %p1029_p6 = por %p46_p4, %p45_p3 }
   0xf   : > { %p1285_p7 = scmp.eq.s32.totalorder %s1007_s19, 1  ;;  %p143_p8 = scmp.eq.s32.totalorder %s640_s20, 1 }
  0x10   : > { %s1289_s26 = scalar_select %p1029_p6, 1, 0 }
  0x11   : > { %p757_p10 = scmp.lt.s32.totalorder %s951_s18, 2  ;;  %p1038_p11 = por %p1285_p7, %p39_p0 }
  0x12   : > { %p1042_p12 = por %p143_p8, %p45_p3  ;;  %s1047_s29 = sand.u32 1, %s947_s17  }
  0x13   : > { %s1290_s27 = scalar_select %p1038_p11, 1, 0 }
  0x14   : > { %s1291_s28 = scalar_select %p1042_p12, 1, 0 }
  0x15   : > { %s663_s30 = sshll.u32 %s951_s18, 7  ;;  %s643_s5 = sshll.u32 %s1047_s29, 3 }
  0x16   : > { %s1054_s8 = scalar_lea.hbm %s1280_s0, %s663_s30  ;;  %s170_s9 = scalar_lea.vmem [#allocation3], %s643_s5 }
  0x17   : > { %s178_s10 = sshll.u32 %s170_s9, 4  ;;  %p1058_p13 = pnand %p757_p10, %p1025_p5  ;;  %s1062_s10 = int_to_ptr.vmem [resolvable:$true] %s178_s10 }
  0x18   : > { %s167_s12 = scalar_lea.sflag [#allocation4], %s1047_s29  ;;  %s799_s13 = scalar_lea.hbm %s1054_s8, 128 }
  0x19   : > { %p800_p2 = scmp.ne.s32.totalorder %s1054_s8, %s799_s13  ;;  %p801_p3 = pneg %p1058_p13 }
  0x1a   : > { %s804_s22 = scalar_lea.hbm %s1280_s0, 256  ;;  %p805_p5 = scmp.lt.s32.totalorder %s1054_s8, %s1280_s0 }
  0x1b   : > { %p802_p4 = pnand %p801_p3, %p800_p2  ;;  %p806_p10 = scmp.lt.s32.totalorder %s804_s22, %s799_s13 }
  0x1d   : > { %p803_p8 = pneg %p802_p4  ;;  %p807_p9 = por %p806_p10, %p805_p5 }
  0x1f   : > { %p808_p7 = pnand %p807_p9, %p803_p8 }
  0x21   : > { %811 = shalt.err (!%p808_p7)
}
  0x22   : > { %s812_s30 = scalar_lea.vmem %s1062_s10, 128  ;;  %s953_s5 = smov [#allocation3]  }
  0x23   : > { %p813_p0 = scmp.ne.s32.totalorder %s1062_s10, %s812_s30  ;;  %s817_s6 = sshll.u32 %s953_s5, 4  ;;  %s818_s6 = int_to_ptr.vmem [resolvable:$false] %s817_s6 }
  0x24   : > { %s819_s7 = scalar_lea.vmem %s818_s6, 256  ;;  %p820_p1 = scmp.lt.s32.totalorder %s1062_s10, %s818_s6 }
  0x25   : > { %p815_p2 = pnand %p813_p0, %p801_p3  ;;  %p821_p12 = scmp.lt.s32.totalorder %s819_s7, %s812_s30 }
  0x27   : > { %p816_p4 = pneg %p815_p2  ;;  %p822_p11 = por %p821_p12, %p820_p1 }
  0x29   : > { %p823_p5 = pnand %p822_p11, %p816_p4 }
  0x2b   : > { %826 = shalt.err (!%p823_p5)
}
  0x2c   : > { %749 = dma.hbm_to_vmem [thread:$0]  (!%p1058_p13), %s1054_s8, 128, %s1062_s10, %s167_s12  }
  0x2d   : > { %p1293_p7 = scmp.lt.s32.totalorder %s951_s18, 3  ;;  %p1294_p9 = scmp.ge.s32.totalorder %s951_s18, 1 }
  0x2e   : > { %s646_s13 = sshll.u32 %s1047_s29, 9  ;;  %s664_s14 = sshll.u32 %s951_s18, 13 }
  0x2f   : > { %p1095_p0 = pnand %p1294_p9, %p1293_p7  ;;  %s1104_s23 = scalar_lea.hbm %s1281_s1, %s664_s14 }
  0x30   : > { %s189_s25 = scalar_lea.vmem [#allocation6], %s646_s13  ;;  %s186_s8 = scalar_lea.sflag [#allocation7], %s1047_s29 }
  0x31   : > { %s196_s30 = sshll.u32 %s189_s25, 4  ;;  %s827_s10 = scalar_lea.hbm %s1104_s23, 8192  ;;  %s1106_s30 = int_to_ptr.vmem [resolvable:$true] %s196_s30 }
  0x32   : > { %p828_p11 = scmp.ne.s32.totalorder %s1104_s23, %s827_s10  ;;  %s832_s6 = scalar_lea.hbm %s1281_s1, 16384 }
  0x33   : > { %p833_p8 = scmp.lt.s32.totalorder %s1104_s23, %s1281_s1  ;;  %p834_p10 = scmp.lt.s32.totalorder %s832_s6, %s827_s10 }
  0x34   : > { %p830_p12 = pnand %p828_p11, %p801_p3 }
  0x35   : > { %p835_p2 = por %p834_p10, %p833_p8 }
  0x36   : > { %p831_p1 = pneg %p830_p12 }
  0x38   : > { %p836_p4 = pnand %p835_p2, %p831_p1 }
  0x3a   : > { %839 = shalt.err (!%p836_p4)
}
  0x3b   : > { %s840_s13 = scalar_lea.vmem %s1106_s30, 8192  ;;  %s954_s20 = smov [#allocation6]  }
  0x3c   : > { %p841_p5 = scmp.ne.s32.totalorder %s1106_s30, %s840_s13  ;;  %s845_s22 = sshll.u32 %s954_s20, 4  ;;  %s846_s22 = int_to_ptr.vmem [resolvable:$false] %s845_s22 }
  0x3d   : > { %s847_s25 = scalar_lea.vmem %s846_s22, 16384  ;;  %p848_p11 = scmp.lt.s32.totalorder %s1106_s30, %s846_s22 }
  0x3e   : > { %p843_p7 = pnand %p841_p5, %p801_p3  ;;  %p849_p12 = scmp.lt.s32.totalorder %s847_s25, %s840_s13 }
  0x40   : > { %p844_p9 = pneg %p843_p7  ;;  %p850_p6 = por %p849_p12, %p848_p11 }
  0x42   : > { %p851_p8 = pnand %p850_p6, %p844_p9 }
  0x44   : > { %854 = shalt.err (!%p851_p8)
}
  0x45   : > { %s955_s10 = smov 128   ;;  %s956_s12 = smov 8  }
  0x46   : > { %752 = dma.hbm_to_vmem [thread:$0]  (!%p1058_p13), %s1104_s23, 8192, %s1106_s30, %s186_s8, %s955_s10, %s955_s10, %s956_s12  }
  0x47   : > { %208 = sbr.rel (%p1095_p0) target bundleno = 379 (0x17b), region = 32  ;;  %s1136_s5 = sand.u32 (!%p1095_p0), 1, %s943_s16  }
  0x48   : > { %s650_s6 = sshll.u32 (!%p1095_p0), %s1136_s5, 3  ;;  %s211_s7 = scalar_lea.sflag (!%p1095_p0), [#allocation4], %s1136_s5 }
  0x49   : > { %s1140_s14 = scalar_lea.vmem (!%p1095_p0), [#allocation3], %s650_s6  ;;  %p1296_p6 = scmp.ne.s32.totalorder (!%p1095_p0), %s1289_s26, 0 }
  0x4c   : > { %922 = dma.done.wait (%p1296_p6), %s211_s7, 128  }
  0x4d   : > { %924 = vsyncadd (%p1296_p6), %s211_s7, 4294967168  ;;  %s651_s29 = sshll.u32 %s1136_s5, 9  ;;  %s220_s11 = scalar_lea.sflag [#allocation7], %s1136_s5 }
  0x4e   : > { %s1148_s9 = scalar_lea.vmem [#allocation6], %s651_s29 }
  0x4f   : > { %926 = dma.done.wait (%p1296_p6), %s220_s11, 8192  }
  0x50   : > { %928 = vsyncadd (%p1296_p6), %s220_s11, 4294959104  ;;  %s1154_s23 = scalar_lea.vmem [#allocation9], %s650_s6  ;;  %p653_p13 = scmp.ne.s32.totalorder %s1007_s19, 0 }
  0x52   : > { %259 = sbr.rel (%p653_p13) target bundleno = 89 (0x59), region = 44 }
  0x57   : > { %v957_v0 = vmov 0.0  }
  0x58   : > { %260 = vst [vmem:[#allocation2] sm:$0x3] %v957_v0 }
  0x59 PF: > { %v294_v1 = vld [vmem:[%s1148_s9 + $0xf8] sm:$0xff]  ;;  %v293_v5 = vld [vmem:[%s1148_s9 + $0xf0] sm:$0xff]  ;;  %v292_v9 = vld [vmem:[%s1148_s9 + $0xe8] sm:$0xff]  ;;  %v958_v31 = vmov 1983009808   ;;  %v332_v33 = vlaneseq  ;;  %p654_p3 = scmp.ne.s32.totalorder %s1007_s19, 1 }
  0x5a   : > { %v326_v2 = vld [vmem:[%s1148_s9 + $0x1f8] sm:$0xff]  ;;  %666 = vmatprep.subr.mxu0 %v294_v1  ;;  %v325_v6 = vld [vmem:[%s1148_s9 + $0x1f0] sm:$0xff]  ;;  %v324_v10 = vld [vmem:[%s1148_s9 + $0x1e8] sm:$0xff]  ;;  %v330_v32 = vunpack.c.l.s4 %v958_v31 }
  0x5b   : > { %v278_v3 = vld [vmem:[%s1148_s9 + $0x78] sm:$0xff]  ;;  %701 = vmatprep.subr.mxu1 %v326_v2  ;;  %v277_v7 = vld [vmem:[%s1148_s9 + $0x70] sm:$0xff]  ;;  %v276_v11 = vld [vmem:[%s1148_s9 + $0x68] sm:$0xff]  ;;  %v333_v43 = vshrl.u32 %v332_v33, 7 }
  0x5c   : > { %v310_v4 = vld [vmem:[%s1148_s9 + $0x178] sm:$0xff]  ;;  %667 = vmatpush3.msra.mxu0 %v278_v3  ;;  %v309_v8 = vld [vmem:[%s1148_s9 + $0x170] sm:$0xff]  ;;  %v308_v12 = vld [vmem:[%s1148_s9 + $0x168] sm:$0xff]  ;;  %v331_v42 = vunpack.c.0.s8 %v330_v32 }
  0x5d   : > { %702 = vmatpush3.msra.mxu1 %v310_v4  ;;  %668 = vmatprep.subr.mxu0 %v293_v5  ;;  %v291_v13 = vld [vmem:[%s1148_s9 + $0xe0] sm:$0xff]  ;;  %v290_v17 = vld [vmem:[%s1148_s9 + $0xd8] sm:$0xff]  ;;  %v289_v21 = vld [vmem:[%s1148_s9 + $0xd0] sm:$0xff] }
  0x5e   : > { %703 = vmatprep.subr.mxu1 %v325_v6  ;;  %669 = vmatpush3.msra.mxu0 %v277_v7  ;;  %v323_v14 = vld [vmem:[%s1148_s9 + $0x1e0] sm:$0xff]  ;;  %v322_v18 = vld [vmem:[%s1148_s9 + $0x1d8] sm:$0xff]  ;;  %v321_v22 = vld [vmem:[%s1148_s9 + $0x1d0] sm:$0xff]  ;;  %v334_v52 = vsub.s32 %v331_v42, %v333_v43 }
  0x5f   : > { %704 = vmatpush3.msra.mxu1 %v309_v8  ;;  %670 = vmatprep.subr.mxu0 %v292_v9  ;;  %v275_v15 = vld [vmem:[%s1148_s9 + $0x60] sm:$0xff]  ;;  %v274_v19 = vld [vmem:[%s1148_s9 + $0x58] sm:$0xff]  ;;  %v273_v23 = vld [vmem:[%s1148_s9 + $0x50] sm:$0xff] }
  0x60   : > { %705 = vmatprep.subr.mxu1 %v324_v10  ;;  %v307_v16 = vld [vmem:[%s1148_s9 + $0x160] sm:$0xff]  ;;  %671 = vmatpush3.msra.mxu0 %v276_v11  ;;  %v306_v20 = vld [vmem:[%s1148_s9 + $0x158] sm:$0xff]  ;;  %v305_v24 = vld [vmem:[%s1148_s9 + $0x150] sm:$0xff] }
  0x61   : > { %706 = vmatpush3.msra.mxu1 %v308_v12  ;;  %672 = vmatprep.subr.mxu0 %v291_v13  ;;  %v288_v25 = vld [vmem:[%s1148_s9 + $0xc8] sm:$0xff]  ;;  %v287_v29 = vld [vmem:[%s1148_s9 + $0xc0] sm:$0xff]  ;;  %v286_v36 = vld [vmem:[%s1148_s9 + $0xb8] sm:$0xff] }
  0x62   : > { %707 = vmatprep.subr.mxu1 %v323_v14  ;;  %673 = vmatpush3.msra.mxu0 %v275_v15  ;;  %v320_v26 = vld [vmem:[%s1148_s9 + $0x1c8] sm:$0xff]  ;;  %v319_v30 = vld [vmem:[%s1148_s9 + $0x1c0] sm:$0xff]  ;;  %v318_v37 = vld [vmem:[%s1148_s9 + $0x1b8] sm:$0xff] }
  0x63   : > { %708 = vmatpush3.msra.mxu1 %v307_v16  ;;  %674 = vmatprep.subr.mxu0 %v290_v17  ;;  %v272_v27 = vld [vmem:[%s1148_s9 + $0x48] sm:$0xff]  ;;  %v271_v34 = vld [vmem:[%s1148_s9 + $0x40] sm:$0xff]  ;;  %v270_v38 = vld [vmem:[%s1148_s9 + $0x38] sm:$0xff] }
  0x64   : > { %709 = vmatprep.subr.mxu1 %v322_v18  ;;  %675 = vmatpush3.msra.mxu0 %v274_v19  ;;  %v304_v28 = vld [vmem:[%s1148_s9 + $0x148] sm:$0xff]  ;;  %v303_v35 = vld [vmem:[%s1148_s9 + $0x140] sm:$0xff]  ;;  %v302_v39 = vld [vmem:[%s1148_s9 + $0x138] sm:$0xff] }
  0x65   : > { %710 = vmatpush3.msra.mxu1 %v306_v20  ;;  %676 = vmatprep.subr.mxu0 %v289_v21  ;;  %v285_v40 = vld [vmem:[%s1148_s9 + $0xb0] sm:$0xff]  ;;  %v284_v46 = vld [vmem:[%s1148_s9 + $0xa8] sm:$0xff]  ;;  %v283_v50 = vld [vmem:[%s1148_s9 + $0xa0] sm:$0xff] }
  0x66   : > { %711 = vmatprep.subr.mxu1 %v321_v22  ;;  %677 = vmatpush3.msra.mxu0 %v273_v23  ;;  %v317_v41 = vld [vmem:[%s1148_s9 + $0x1b0] sm:$0xff]  ;;  %v316_v47 = vld [vmem:[%s1148_s9 + $0x1a8] sm:$0xff]  ;;  %v315_v51 = vld [vmem:[%s1148_s9 + $0x1a0] sm:$0xff] }
  0x67   : > { %712 = vmatpush3.msra.mxu1 %v305_v24  ;;  %678 = vmatprep.subr.mxu0 %v288_v25  ;;  %v269_v44 = vld [vmem:[%s1148_s9 + $0x30] sm:$0xff]  ;;  %v268_v48 = vld [vmem:[%s1148_s9 + $0x28] sm:$0xff]  ;;  %v267_v53 = vld [vmem:[%s1148_s9 + $0x20] sm:$0xff] }
  0x68   : > { %713 = vmatprep.subr.mxu1 %v320_v26  ;;  %679 = vmatpush3.msra.mxu0 %v272_v27  ;;  %v301_v45 = vld [vmem:[%s1148_s9 + $0x130] sm:$0xff]  ;;  %v300_v49 = vld [vmem:[%s1148_s9 + $0x128] sm:$0xff]  ;;  %v299_v54 = vld [vmem:[%s1148_s9 + $0x120] sm:$0xff] }
  0x69   : > { %714 = vmatpush3.msra.mxu1 %v304_v28  ;;  %680 = vmatprep.subr.mxu0 %v287_v29  ;;  %v262_v55 = vld [vmem:[%s1140_s14] sm:$0xff]  ;;  %v280_v3 = vld [vmem:[%s1148_s9 + $0x88] sm:$0xff]  ;;  %v279_v7 = vld [vmem:[%s1148_s9 + $0x80] sm:$0xff] }
  0x6a   : > { %715 = vmatprep.subr.mxu1 %v319_v30  ;;  %681 = vmatpush3.msra.mxu0 %v271_v34  ;;  %v282_v56 = vld [vmem:[%s1148_s9 + $0x98] sm:$0xff]  ;;  %v328_v58 = vcombine.high %v262_v55, %v262_v55  ;;  %v281_v61 = vld [vmem:[%s1148_s9 + $0x90] sm:$0xff]  ;;  %v335_v63 = vrot.slane %v262_v55, %v334_v52  ;;  %v312_v4 = vld [vmem:[%s1148_s9 + $0x188] sm:$0xff]  ;;  %v492_v13 = vmax.f32 %v262_v55, 0.0 }
  0x6b   : > { %716 = vmatpush3.msra.mxu1 %v303_v35  ;;  %682 = vmatprep.subr.mxu0 %v286_v36  ;;  %v314_v57 = vld [vmem:[%s1148_s9 + $0x198] sm:$0xff]  ;;  %v313_v62 = vld [vmem:[%s1148_s9 + $0x190] sm:$0xff]  ;;  %v264_v5 = vld [vmem:[%s1148_s9 + $0x8] sm:$0xff] }
  0x6c   : > { %717 = vmatprep.subr.mxu1 %v318_v37  ;;  %683 = vmatpush3.msra.mxu0 %v270_v38  ;;  %v266_v59 = vld [vmem:[%s1148_s9 + $0x18] sm:$0xff]  ;;  %v265_v0 = vld [vmem:[%s1148_s9 + $0x10] sm:$0xff]  ;;  %v342_v2 = vrot.slane %v328_v58, %v334_v52  ;;  %v296_v6 = vld [vmem:[%s1148_s9 + $0x108] sm:$0xff]  ;;  %v343_v9 = vcombine.high %v335_v63, %v335_v63  ;;  %493 = vst [vmem:[%s1154_s23] sm:$0xff] %v492_v13 }
  0x6d   : > { %718 = vmatpush3.msra.mxu1 %v302_v39  ;;  %684 = vmatprep.subr.mxu0 %v285_v40  ;;  %v298_v60 = vld [vmem:[%s1148_s9 + $0x118] sm:$0xff]  ;;  %v297_v1 = vld [vmem:[%s1148_s9 + $0x110] sm:$0xff]  ;;  %v311_v8 = vld [vmem:[%s1148_s9 + $0x180] sm:$0xff] }
  0x6e   : > { %719 = vmatprep.subr.mxu1 %v317_v41  ;;  %685 = vmatpush3.msra.mxu0 %v269_v44  ;;  %v263_v10 = vld [vmem:[%s1148_s9] sm:$0xff]  ;;  %v344_v11 = vcombine.high %v342_v2, %v342_v2  ;;  %v261_v20 = vld [vmem:[#allocation2] sm:$0x3] }
  0x6f   : > { %720 = vmatpush3.msra.mxu1 %v301_v45  ;;  %686 = vmatprep.subr.mxu0 %v284_v46  ;;  %v295_v12 = vld [vmem:[%s1148_s9 + $0x100] sm:$0xff] }
  0x70   : > { %721 = vmatprep.subr.mxu1 %v316_v47  ;;  %687 = vmatpush3.msra.mxu0 %v268_v48 }
  0x71   : > { %722 = vmatpush3.msra.mxu1 %v300_v49  ;;  %688 = vmatprep.subr.mxu0 %v283_v50 }
  0x72   : > { %723 = vmatprep.subr.mxu1 %v315_v51  ;;  %689 = vmatpush3.msra.mxu0 %v267_v53 }
  0x73   : > { %724 = vmatpush3.msra.mxu1 %v299_v54  ;;  %690 = vmatprep.subr.mxu0 %v282_v56 }
  0x74   : > { %725 = vmatprep.subr.mxu1 %v314_v57  ;;  %691 = vmatpush3.msra.mxu0 %v266_v59 }
  0x75   : > { %726 = vmatpush3.msra.mxu1 %v298_v60  ;;  %692 = vmatprep.subr.mxu0 %v281_v61 }
  0x76   : > { %727 = vmatprep.subr.mxu1 %v313_v62  ;;  %693 = vmatpush3.msra.mxu0 %v265_v0 }
  0x77   : > { %728 = vmatpush3.msra.mxu1 %v297_v1  ;;  %694 = vmatprep.subr.mxu0 %v280_v3 }
  0x78   : > { %729 = vmatprep.subr.mxu1 %v312_v4  ;;  %695 = vmatpush3.msra.mxu0 %v264_v5 }
  0x79   : > { %730 = vmatpush3.msra.mxu1 %v296_v6  ;;  %696 = vmatprep.subr.mxu0 %v279_v7 }
  0x7a   : > { %731 = vmatprep.subr.mxu1 %v311_v8  ;;  %697 = vmatpush3.msra.mxu0 %v263_v10 }
  0x7b   : > { %413 = vmatprep.mubr.f32.mxu0 %v343_v9  ;;  %732 = vmatpush3.msra.mxu1 %v295_v12 }
  0x7c   : > { %483 = vmatprep.mubr.f32.mxu1 %v344_v11  ;;  %414 = vmatmul.mubr.f32.vlgmr.msra.gmra.mxu0 %v335_v63 }
  0x7d   : > { %484 = vmatmul.mubr.f32.vlgmr.msra.gmra.mxu1 %v342_v2 }
 0x13c   : > { %v698_v14 = vpop.f32.mrf.mxu0 }
 0x13d   : > { %v733_v15 = vpop.f32.mrf.mxu1 }
 0x13e   : > { %v699_v16 = vpop.f32.mrf.mxu0 }
 0x13f   : > { %v734_v17 = vpop.f32.mrf.mxu1  ;;  %v700_v18 = vadd.f32 %v699_v16, %v698_v14 }
 0x140   : > { %v735_v19 = vadd.f32 %v734_v17, %v733_v15 }
 0x142   : > { %v486_v21 = vadd.f32 %v735_v19, %v700_v18  ;;  %497 = sbr.rel (%p654_p3) target bundleno = 337 (0x151), region = 48 }
 0x144   : > { %v489_v22 = vadd.f32 %v486_v21, %v261_v20 }
 0x146   : > { %490 = vst [vmem:[#allocation2] sm:$0x3] %v489_v22 }
 0x147   : > { %v655_v24 = vld [vmem:[%s1282_s2] ss:$0 sm:$0xff] }
 0x14d   : > { %v498_v23 = vld [vmem:[#allocation2] sm:$0x3] }
 0x14e   : > { %v506_v25 = vadd.f32 %v655_v24, %v498_v23 }
 0x150   : > { %507 = vst [vmem:[#allocation8] sm:$0x3] %v506_v25 }
 0x151 PF: > { %s959_s8 = smov [#allocation8]   ;;  %s665_s20 = sshll.u32 %s1007_s19, 7 }
 0x152   : > { %s520_s13 = sshll.u32 %s959_s8, 4  ;;  %s1231_s10 = scalar_lea.hbm %s1284_s4, %s665_s20  ;;  %s521_s13 = int_to_ptr.vmem [resolvable:$true] %s520_s13 }
 0x153   : > { %s855_s12 = scalar_lea.vmem %s521_s13, 32  ;;  %p1297_p1 = scmp.eq.s32.totalorder %s1007_s19, 1 }
 0x154   : > { %p856_p0 = scmp.ne.s32.totalorder %s521_s13, %s855_s12  ;;  %p862_p4 = scmp.lt.s32.totalorder %s521_s13, %s521_s13 }
 0x155   : > { %p863_p5 = scmp.lt.s32.totalorder %s855_s12, %s855_s12 }
 0x156   : > { %p857_p10 = pnand %p856_p0, %p1297_p1 }
 0x157   : > { %p864_p7 = por %p863_p5, %p862_p4 }
 0x158   : > { %p858_p2 = pneg %p857_p10 }
 0x15a   : > { %p865_p9 = pnand %p864_p7, %p858_p2 }
 0x15c   : > { %868 = shalt.err (!%p865_p9)
}
 0x15d   : > { %p1298_p11 = pmov %p1297_p1  ;;  %s534_s14 = sshll.u32 %s1154_s23, 4  ;;  %s535_s14 = int_to_ptr.vmem [resolvable:$true] %s534_s14 }
 0x15e   : > { %s509_s29 = scalar_lea.sflag [#allocation10], %s1136_s5  ;;  %s879_s11 = scalar_lea.vmem %s535_s14, 128 }
 0x15f   : > { %741 = dma.vmem_to_hbm [thread:$0]  (%p1298_p11), %s521_s13, 32, %s1283_s3, [#allocation5]  }
 0x160   : > { %p880_p12 = scmp.ne.s32.totalorder %s535_s14, %s879_s11  ;;  %p1299_p8 = scmp.ne.s32.totalorder %s1290_s27, 0 }
 0x161   : > { %s960_s9 = smov [#allocation9]  }
 0x162   : > { %p881_p6 = pnand %p880_p12, %p1299_p8  ;;  %s883_s26 = sshll.u32 %s960_s9, 4  ;;  %s884_s26 = int_to_ptr.vmem [resolvable:$false] %s883_s26 }
 0x163   : > { %s885_s30 = scalar_lea.vmem %s884_s26, 256  ;;  %p886_p3 = scmp.lt.s32.totalorder %s535_s14, %s884_s26 }
 0x164   : > { %p882_p13 = pneg %p881_p6  ;;  %p887_p0 = scmp.lt.s32.totalorder %s885_s30, %s879_s11 }
 0x166   : > { %p888_p1 = por %p887_p0, %p886_p3 }
 0x168   : > { %p889_p10 = pnand %p888_p1, %p882_p13 }
 0x16a   : > { %892 = shalt.err (!%p889_p10)
}
 0x16b   : > { %s893_s23 = scalar_lea.hbm %s1231_s10, 128  ;;  %s897_s13 = scalar_lea.hbm %s1284_s4, 256 }
 0x16c   : > { %p894_p2 = scmp.ne.s32.totalorder %s1231_s10, %s893_s23  ;;  %p898_p7 = scmp.lt.s32.totalorder %s1231_s10, %s1284_s4 }
 0x16d   : > { %p899_p9 = scmp.lt.s32.totalorder %s897_s13, %s893_s23 }
 0x16e   : > { %p895_p4 = pnand %p894_p2, %p1299_p8 }
 0x16f   : > { %p900_p11 = por %p899_p9, %p898_p7 }
 0x170   : > { %p896_p5 = pneg %p895_p4 }
 0x172   : > { %p901_p12 = pnand %p900_p11, %p896_p5 }
 0x174   : > { %904 = shalt.err (!%p901_p12)
}
 0x175   : > { %742 = dma.vmem_to_hbm [thread:$0]  (%p1299_p8), %s535_s14, 128, %s1231_s10, %s509_s29  }
 0x176   : > { %p1300_p6 = scmp.eq.s32.totalorder %s1007_s19, 1 }
 0x178   : > { %930 = dma.done.wait (%p1300_p6), [#allocation5], 32   ;;  %p1301_p13 = pmov %p1300_p6 }
 0x17a   : > { %932 = vsyncadd (%p1301_p13), [#allocation5], 4294967264 }
 0x17b PF: > { %s550_s25 = sand.u32 1, %s939_s15   ;;  %p1302_p3 = scmp.ne.s32.totalorder %s1291_s28, 0 }
 0x17c   : > { %p1303_p0 = scmp.ge.s32.totalorder %s951_s18, 2  ;;  %s551_s12 = scalar_lea.sflag [#allocation10], %s550_s25 }
 0x17e   : > { %p754_p1 = pnand %p1303_p0, %p1302_p3 }
 0x180   : > { %p755_p10 = pneg %p754_p1 }
 0x182   : > { %934 = dma.done.wait (%p755_p10), %s551_s12, 128  }
 0x183   : > { %936 = vsyncadd (%p755_p10), %s551_s12, 4294967168  ;;  %p22_p8 = scmp.ge.s32.totalorder %s1011_s21, 4   ;;  %s1304_s15 = smov %s943_s16 }
 0x184   : > { %s1305_s16 = smov %s947_s17  ;;  %s1306_s17 = smov %s1023_s24 }
 0x185   : > { %s1307_s18 = smov %s1011_s21  ;;  %24 = sbr.rel (!%p22_p8) target bundleno = 8 (0x8), region = 107 }
 0x18a   :  { %556 = vsyncpa [#allocation4], 1 }
 0x18b   :  { %558 = vsyncpa [#allocation4 + $0x1], 1 }
 0x18c   :  { %559 = vsyncpa [#allocation7], 1 }
 0x18d   :  { %561 = vsyncpa [#allocation7 + $0x1], 1 }
 0x18e   :  { %562 = vsyncpa [#allocation5], 1 }
 0x18f   :  { %564 = vsyncpa [#allocation5 + $0x1], 1 }
 0x190   :  { %565 = vsyncpa [#allocation10], 1 }
 0x191   :  { %567 = vsyncpa [#allocation10 + $0x1], 1 }

</bundles_post_ra>
